<compile_context>
chip_gen: v6e
topology: v6e:2x2x1
jax: 0.10.0
libtpu: 0.0.40
codegen_flags: <defaults>
</compile_context>

<pallas_src>
import functools

import jax
import jax.numpy as jnp
from jax.experimental import pallas as pl
from jax.experimental.pallas import tpu as pltpu


def _round_up(x, m):
    return (x + m - 1) // m * m


def _vmem_capacity_bytes():
    fn = getattr(pltpu, "get_tpu_info", None)
    if fn is None:
        return 64 * 1024 * 1024
    try:
        info = fn()
    except Exception:
        return 64 * 1024 * 1024
    for attr in ("vmem_capacity_bytes", "vmem_bytes", "vmem_size_bytes"):
        v = getattr(info, attr, None)
        if isinstance(v, int) and v > 0:
            return v
    return 64 * 1024 * 1024


_VMEM_BYTES = _vmem_capacity_bytes()
_BIG_VMEM = _VMEM_BYTES >= 100 * 1024 * 1024          # v5e / v6e (128 MiB per core)
_VMEM_LIMIT = (96 if _BIG_VMEM else 48) * 1024 * 1024  # v7x: stay well under 64 MiB
_TM_CAP = 1024 if _BIG_VMEM else 512
_TN_CAP = 512 if _BIG_VMEM else 256
_TK_CAP = 2048 if _BIG_VMEM else 1024

_TK_DENSE = 128     # K skip granularity for the dense-layer 1x1 conv
_ROW_CHUNK = 256    # in-kernel row chunk for the 3x3 (kn2row) stage
_GROWTH = 48
_BOTT = 192         # bn_size * growth_rate


def _pick_tile(dim, cap, quantum):
    """Largest tile <= cap that divides `dim` and is a multiple of `quantum`.
    Falls back to the full dim (always a legal BlockSpec block size)."""
    if dim <= cap:
        return dim
    t = (cap // quantum) * quantum
    while t >= quantum:
        if dim % t == 0:
            return t
        t -= quantum
    return dim


def _pick_tm(m):
    cap = _TM_CAP
    if m >= 16:                       # keep >= 2 M tiles so both v7x cores are fed
        cap = min(cap, max(8, (m // 2) // 8 * 8))
    return _pick_tile(m, cap, 8)


def _shrink_tm(m, tm, tn, tk):
    """Guard the full-dim fallback against the per-core VMEM budget (review: v7x)."""
    limit = _VMEM_LIMIT // 2

    def est(t):
        return 2 * 2 * (t * tk + tk * tn + t * tn) + 4 * t * tn

    while tm > 8 and est(tm) > limit:
        cand = _pick_tile(m, max(8, (tm // 2) // 8 * 8), 8)
        if cand >= tm:
            break
        tm = cand
    return tm


# ----------------------------------------------------------------------------- #
# Fused matmul kernel:  A @ W  -> * scale + shift -> relu?                        #
# (conv0, transition 1x1 convs, classifier)                                       #
# ----------------------------------------------------------------------------- #
def _matmul_kernel(a_ref, w_ref, qs_ref, qb_ref, o_ref, acc_ref, *, post_relu):
    k = pl.program_id(2)

    @pl.when(k == 0)
    def _():
        acc_ref[...] = jnp.zeros_like(acc_ref)

    acc_ref[...] += jnp.dot(a_ref[...], w_ref[...],
                            preferred_element_type=jnp.float32)     # MXU, f32 accum

    @pl.when(k == pl.num_programs(2) - 1)
    def _():
        out = acc_ref[...] * qs_ref[...] + qb_ref[...]               # folded BN / bias
        if post_relu:
            out = jnp.maximum(out, 0.0)
        o_ref[...] = out.astype(o_ref.dtype)


@functools.partial(jax.jit, static_argnames=("post_relu", "out_dtype"))
def _matmul_call(a, w, qs, qb, *, post_relu, out_dtype):
    m, k = a.shape
    n = w.shape[1]
    tm = _pick_tm(m)
    tn = _pick_tile(n, _TN_CAP, 128)
    tk = _pick_tile(k, _TK_CAP, 128)
    tm = _shrink_tm(m, tm, tn, tk)
    kernel = functools.partial(_matmul_kernel, post_relu=post_relu)
    return pl.pallas_call(
        kernel,
        out_shape=jax.ShapeDtypeStruct((m, n), out_dtype),
        grid=(m // tm, n // tn, k // tk),
        in_specs=[
            pl.BlockSpec((tm, tk), lambda i, j, kk: (i, kk)),
            pl.BlockSpec((tk, tn), lambda i, j, kk: (kk, j)),
            pl.BlockSpec((1, tn), lambda i, j, kk: (0, j)),
            pl.BlockSpec((1, tn), lambda i, j, kk: (0, j)),
        ],
        out_specs=pl.BlockSpec((tm, tn), lambda i, j, kk: (i, j)),
        scratch_shapes=[pltpu.VMEM((tm, tn), jnp.float32)],
        compiler_params=pltpu.CompilerParams(
            dimension_semantics=("parallel", "parallel", "arbitrary"),
            vmem_limit_bytes=_VMEM_LIMIT),
    )(a, w, qs, qb)


def fused_matmul(a, w, post_scale=None, post_shift=None, post_relu=False,
                 out_dtype=jnp.bfloat16):
    m, k = a.shape
    kw, n = w.shape
    assert k == kw, (k, kw)
    if post_scale is None:
        post_scale = jnp.ones((n,), jnp.float32)
    if post_shift is None:
        post_shift = jnp.zeros((n,), jnp.float32)
    return _matmul_call(
        a.astype(jnp.bfloat16), w.astype(jnp.bfloat16),
        post_scale.astype(jnp.float32).reshape(1, n),
        post_shift.astype(jnp.float32).reshape(1, n),
        post_relu=post_relu, out_dtype=out_dtype)


# ----------------------------------------------------------------------------- #
# Fused dense layer: norm1+relu1+conv1(1x1) -> norm2+relu2 -> conv2(3x3, kn2row)  #
# One pallas_call; bottleneck stays in VMEM; true K via scalar prefetch.          #
# ----------------------------------------------------------------------------- #
def _dense_layer_kernel(nk_ref, buf_ref, w1_ref, n1s_ref, n1b_ref,
                        n2s_ref, n2b_ref, w2_ref, out_ref,
                        bott_ref, y_ref, *, r, h, w, pad0, chunk):
    k = pl.program_id(1)
    nk = nk_ref[0]

    @pl.when(k == 0)
    def _init():
        bott_ref[...] = jnp.zeros_like(bott_ref)

    # 1x1 conv over valid K blocks only (zero blocks skipped: no DMA via index clamp,
    # no MACs via this pl.when).
    @pl.when(k < nk)
    def _accumulate():
        a = buf_ref[0].astype(jnp.float32) * n1s_ref[...] + n1b_ref[...]   # norm1
        a = jnp.maximum(a, 0.0).astype(jnp.bfloat16)                       # relu1
        bott_ref[...] += jnp.dot(a, w1_ref[...],
                                 preferred_element_type=jnp.float32)       # conv1

    @pl.when(k == pl.num_programs(1) - 1)
    def _finalize():
        s2 = n2s_ref[...]
        b2 = n2b_ref[...]
        w2 = w2_ref[...]
        # (a) norm2 + relu2 + kn2row matmul: Y[:, 48t:48t+48] = act @ W2[tap t].
        #     Chunked over rows; result streamed to the f32 VMEM scratch y_ref.
        for c0 in range(0, r, chunk):
            sz = min(chunk, r - c0)
            act = jnp.maximum(bott_ref[c0:c0 + sz, :] * s2 + b2, 0.0)
            y_ref[pad0 + c0:pad0 + c0 + sz, :] = jnp.dot(
                act.astype(jnp.bfloat16), w2, preferred_element_type=jnp.float32)
        # (b) combine the 9 taps with row-shifted, edge-masked adds on the 48-wide
        #     f32 accumulator (rows outside the image are masked, so the unwritten
        #     pad rows of y_ref never contribute).
        for r0 in range(0, r, chunk):
            sz = min(chunk, r - r0)
            rr = jax.lax.broadcasted_iota(jnp.int32, (sz, 1), 0) + r0
            yy = rr // w
            xx = rr % w
            acc = jnp.zeros((sz, _GROWTH), jnp.float32)
            for ky in range(3):
                for kx in range(3):
                    t = ky * 3 + kx
                    off = (ky - 1) * w + (kx - 1)
                    row0 = pad0 + r0 + off
                    v = y_ref[row0:row0 + sz, _GROWTH * t:_GROWTH * t + _GROWTH]
                    m = None
                    if ky == 0:
                        m = yy >= 1
                    elif ky == 2:
                        m = yy <= h - 2
                    if kx == 0:
                        m = (xx >= 1) if m is None else (m & (xx >= 1))
                    elif kx == 2:
                        m = (xx <= w - 2) if m is None else (m & (xx <= w - 2))
                    if m is not None:
                        v = jnp.where(m, v, 0.0)
                    acc = acc + v
            out_ref[0, r0:r0 + sz, :] = acc.astype(out_ref.dtype)


@functools.partial(jax.jit, static_argnames=("h", "w"), donate_argnums=(0,))
def _dense_layer(buf, nk, c_off, w1, n1s, n1b, n2s, n2b, w2, *, h, w):
    """One dense layer, writing its 48 new channels in place into the donated buffer.

    buf:   (n, h*w, cfp) bf16 block buffer.
    nk:    (1,) int32 = ceil(cin / 128), number of valid K blocks (scalar prefetch).
    c_off: channel offset for the 48 new channels.
    """
    n, r, cfp = buf.shape
    tk = _TK_DENSE
    assert cfp % tk == 0
    pad0 = _round_up(w + 1, 8)
    r2 = pad0 + _round_up(r + w + 2, 8)
    nkmax = cfp // tk
    kernel = functools.partial(_dense_layer_kernel, r=r, h=h, w=w, pad0=pad0,
                               chunk=_ROW_CHUNK)

    def kmap(kk, nkr):
        return jnp.minimum(kk, nkr[0] - 1)

    new = pl.pallas_call(
        kernel,
        out_shape=jax.ShapeDtypeStruct((n, r, _GROWTH), jnp.bfloat16),
        grid_spec=pltpu.PrefetchScalarGridSpec(
            num_scalar_prefetch=1,
            grid=(n, nkmax),
            in_specs=[
                pl.BlockSpec((1, r, tk), lambda b, kk, nkr: (b, 0, kmap(kk, nkr))),
                pl.BlockSpec((tk, _BOTT), lambda b, kk, nkr: (kmap(kk, nkr), 0)),
                pl.BlockSpec((1, tk), lambda b, kk, nkr: (0, kmap(kk, nkr))),
                pl.BlockSpec((1, tk), lambda b, kk, nkr: (0, kmap(kk, nkr))),
                pl.BlockSpec((1, _BOTT), lambda b, kk, nkr: (0, 0)),
                pl.BlockSpec((1, _BOTT), lambda b, kk, nkr: (0, 0)),
                pl.BlockSpec((_BOTT, 9 * _GROWTH), lambda b, kk, nkr: (0, 0)),
            ],
            out_specs=pl.BlockSpec((1, r, _GROWTH), lambda b, kk, nkr: (b, 0, 0)),
            scratch_shapes=[pltpu.VMEM((r, _BOTT), jnp.float32),        # bottleneck
                            pltpu.VMEM((r2, 9 * _GROWTH), jnp.float32)],  # kn2row Y
        ),
        compiler_params=pltpu.CompilerParams(
            dimension_semantics=("parallel", "arbitrary"),
            vmem_limit_bytes=_VMEM_LIMIT),
    )(nk, buf, w1, n1s, n1b, n2s, n2b, w2)
    # drop_rate == 0 -> dropout is identity.  Donated in-place channel append.
    return jax.lax.dynamic_update_slice(buf, new, (0, 0, c_off))


# ----------------------------------------------------------------------------- #
# norm5 + ReLU + global average pool (fused reduction kernel)                     #
# ----------------------------------------------------------------------------- #
def _bn_relu_gap_kernel(x_ref, s_ref, b_ref, o_ref):
    x = x_ref[0].astype(jnp.float32)                         # (HW, C)
    y = jnp.maximum(x * s_ref[...] + b_ref[...], 0.0)        # norm5 + relu, fused
    o_ref[...] = (jnp.sum(y, axis=0, keepdims=True)
                  * (1.0 / x_ref.shape[1])).astype(o_ref.dtype)


@jax.jit
def _bn_relu_gap_call(x, scale, shift):
    n, hw, c = x.shape
    return pl.pallas_call(
        _bn_relu_gap_kernel,
        out_shape=jax.ShapeDtypeStruct((n, c), jnp.bfloat16),
        grid=(n,),
        in_specs=[pl.BlockSpec((1, hw, c), lambda b: (b, 0, 0)),
                  pl.BlockSpec((1, c), lambda b: (0, 0)),
                  pl.BlockSpec((1, c), lambda b: (0, 0))],
        out_specs=pl.BlockSpec((1, c), lambda b: (b, 0)),
        compiler_params=pltpu.CompilerParams(
            dimension_semantics=("parallel",),
            vmem_limit_bytes=_VMEM_LIMIT),
    )(x, scale.reshape(1, c), shift.reshape(1, c))


# ----------------------------------------------------------------------------- #
# Plain-JAX glue: conv0 patch extraction, pooling (XLA-fused, no HBM duplication) #
# ----------------------------------------------------------------------------- #
def _extract_patches(x, kh, kw, stride, pad, pad_value=0.0):
    n, h, w, c = x.shape
    xp = jnp.pad(x, ((0, 0), (pad, pad), (pad, pad), (0, 0)),
                 constant_values=pad_value)
    ho = (h + 2 * pad - kh) // stride + 1
    wo = (w + 2 * pad - kw) // stride + 1
    taps = []
    for i in range(kh):
        for j in range(kw):
            taps.append(xp[:, i:i + stride * ho:stride, j:j + stride * wo:stride, :])
    return jnp.stack(taps, axis=3), ho, wo


@jax.jit
def _stem(x, conv0_w, s0, b0):
    """conv0 (7x7 s2 p3, fused with norm0+relu0 epilogue) + pool0 (maxpool 3x3 s2 p1)."""
    n, _, _, _ = x.shape
    p, ho, wo = _extract_patches(x, 7, 7, 2, 3)
    y = fused_matmul(p.reshape(n * ho * wo, -1), conv0_w,
                     post_scale=s0, post_shift=b0, post_relu=True)
    y = y.reshape(n, ho, wo, -1)
    # MaxPool2d(3, 2, padding=1): nine XLA-fused strided slices (no im2col in HBM).
    hp, wp = ho // 2, wo // 2
    yp = jnp.pad(y, ((0, 0), (1, 1), (1, 1), (0, 0)), constant_values=-jnp.inf)
    best = None
    for ky in range(3):
        for kx in range(3):
            s = yp[:, ky:ky + 2 * hp:2, kx:kx + 2 * wp:2, :]
            best = s if best is None else jnp.maximum(best, s)
    return best


@functools.partial(jax.jit, static_argnames=("h", "w"))
def _transition(buf, tp, *, h, w):
    """Transition: norm + relu + AvgPool2d(2) + conv1x1.
    AvgPool2d is moved in front of the 1x1 conv (exactly commutes; conv has no bias),
    so the matmul runs on 4x fewer rows.  BN+ReLU+pool is one fused XLA reduction."""
    n, r, cfp = buf.shape
    s, b = tp["norm"]
    x = buf.reshape(n, h, w, cfp).astype(jnp.float32) * s + b
    x = jnp.maximum(x, 0.0)
    x = x.reshape(n, h // 2, 2, w // 2, 2, cfp).mean(axis=(2, 4)).astype(jnp.bfloat16)
    ho, wo = h // 2, w // 2
    y = fused_matmul(x.reshape(n * ho * wo, cfp), tp["conv"], out_dtype=jnp.bfloat16)
    return y.reshape(n, ho, wo, -1)


# ----------------------------------------------------------------------------- #
# Parameters (deterministic synthetic init; shapes follow densenet161 __init__)   #
# Weight layout assumption: conv weights are tap-major (kh*kw*cin, cout); real     #
# torchvision (cout,cin,kh,kw) weights would need an explicit permute.            #
# ----------------------------------------------------------------------------- #
def make_params(key, in_channel, num_classes):
    growth_rate, bn_size = _GROWTH, 4
    block_config = (6, 12, 36, 24)
    num_init_features = 96
    eps = 1e-5
    keys = iter(jax.random.split(key, 4096))

    def conv_w(kh, kw, cin, cout):
        fan_in = kh * kw * cin
        wmat = jax.random.normal(next(keys), (kh * kw * cin, cout), jnp.float32)
        return (wmat * jnp.sqrt(2.0 / fan_in)).astype(jnp.bfloat16)

    def bn(c):  # folded (scale, shift) for inference-mode BatchNorm2d
        gamma = 1.0 + 0.1 * jax.random.normal(next(keys), (c,), jnp.float32)
        beta = 0.1 * jax.random.normal(next(keys), (c,), jnp.float32)
        r_mean = 0.1 * jax.random.normal(next(keys), (c,), jnp.float32)
        r_var = 1.0 + 0.1 * jax.random.uniform(next(keys), (c,), jnp.float32)
        scale = gamma / jnp.sqrt(r_var + eps)
        shift = beta - r_mean * scale
        return scale, shift

    params = {"conv0": conv_w(7, 7, in_channel, num_init_features),
              "norm0": bn(num_init_features)}

    nf = num_init_features
    blocks, transitions = [], []
    for bi, num_layers in enumerate(block_config):
        c_final = nf + num_layers * growth_rate
        cfp = _round_up(c_final, _TK_DENSE)           # padded block width (128-mult)
        layers = []
        for li in range(num_layers):
            cin = nf + li * growth_rate
            s1, b1 = bn(cin)
            w1 = conv_w(1, 1, cin, bn_size * growth_rate)
            s2, b2 = bn(bn_size * growth_rate)
            w2 = conv_w(3, 3, bn_size * growth_rate, growth_rate)   # (9*192, 48)
            kpad = cfp - cin
            # Zero-pad norm1/conv1 to the padded block width: one compiled kernel per
            # block; the padded K blocks are skipped at runtime via scalar prefetch.
            layers.append(dict(
                n1s=jnp.pad(s1, (0, kpad)).reshape(1, cfp),
                n1b=jnp.pad(b1, (0, kpad)).reshape(1, cfp),
                conv1=jnp.pad(w1, ((0, kpad), (0, 0))),
                n2s=s2.reshape(1, -1), n2b=b2.reshape(1, -1),
                # kn2row layout: (192, 9*48), tap t in columns [48t, 48t+48)
                conv2=w2.reshape(9, bn_size * growth_rate, growth_rate)
                        .transpose(1, 0, 2)
                        .reshape(bn_size * growth_rate, 9 * growth_rate)))
        blocks.append(dict(layers=layers, c_in=nf, c_final=c_final, cfp=cfp))
        nf = c_final
        if bi != len(block_config) - 1:
            cout = nf // 2
            cout_pad = _round_up(cout, 128)           # lane-dense output stores
            s, b = bn(nf)
            wt = conv_w(1, 1, nf, cout)
            transitions.append(dict(
                norm=(jnp.pad(s, (0, cfp - nf)), jnp.pad(b, (0, cfp - nf))),
                conv=jnp.pad(wt, ((0, cfp - nf), (0, cout_pad - cout)))))
            nf = cout
    params["blocks"] = blocks
    params["transitions"] = transitions

    cfp_last = blocks[-1]["cfp"]
    s5, b5 = bn(nf)
    params["norm5"] = (jnp.pad(s5, (0, cfp_last - nf)),
                       jnp.pad(b5, (0, cfp_last - nf)))
    wc = jax.random.normal(next(keys), (nf, num_classes), jnp.float32) * jnp.sqrt(1.0 / nf)
    wc = jnp.pad(wc, ((0, cfp_last - nf), (0, 0)))
    params["classifier"] = (wc.astype(jnp.bfloat16),
                            jnp.zeros((num_classes,), jnp.float32))
    return params


# ----------------------------------------------------------------------------- #
# Forward pass                                                                    #
# ----------------------------------------------------------------------------- #
def densenet161_forward(x_nchw, params):
    x = jnp.transpose(x_nchw, (0, 2, 3, 1)).astype(jnp.bfloat16)   # NCHW -> NHWC
    n = x.shape[0]

    s0, b0 = params["norm0"]
    x = _stem(x, params["conv0"], s0, b0)                          # (n, h, w, 96)

    n_blocks = len(params["blocks"])
    for bi, block in enumerate(params["blocks"]):
        _, h, w, cpad = x.shape
        r = h * w
        cfp = block["cfp"]
        # Preallocated "concat" buffer for the whole block (no per-layer concatenate).
        buf = jnp.pad(x.reshape(n, r, cpad), ((0, 0), (0, 0), (0, cfp - cpad)))
        for li, lp in enumerate(block["layers"]):
            cin = block["c_in"] + li * _GROWTH
            nk = jnp.asarray([-(-cin // _TK_DENSE)], jnp.int32)    # ceil(cin / 128)
            buf = _dense_layer(buf, nk, cin,
                               lp["conv1"], lp["n1s"], lp["n1b"],
                               lp["n2s"], lp["n2b"], lp["conv2"], h=h, w=w)
        if bi != n_blocks - 1:
            x = _transition(buf, params["transitions"][bi], h=h, w=w)
        else:
            x = buf                                                # (n, r, cfp)

    # features.norm5 + F.relu + adaptive_avg_pool2d((1,1)) + flatten, fused
    s5, b5 = params["norm5"]
    y = _bn_relu_gap_call(x, s5, b5)                               # (n, cfp)

    # classifier (Linear, bias fused as epilogue shift)
    wc, bc = params["classifier"]
    return fused_matmul(y, wc, post_shift=bc, out_dtype=jnp.float32)


# ----------------------------------------------------------------------------- #
if __name__ == "__main__":
    num_classes = 10
    in_channel = 4
    batch = 2
    spatial = 32  # smallest spatial size the 4-block densenet161 topology supports

    key = jax.random.PRNGKey(0)
    kp, kx = jax.random.split(key)
    params = make_params(kp, in_channel, num_classes)
    x = jax.random.normal(kx, (batch, in_channel, spatial, spatial), jnp.float32)  # NCHW

    out = densenet161_forward(x, params)
    out = jax.block_until_ready(out)
    assert out.shape == (batch, num_classes), out.shape
    assert bool(jnp.all(jnp.isfinite(out)))
    print("KERNEL_OK")
</pallas_src>

<mosaic_0001>
module attributes {stable_mosaic.version = 11 : i64} {
  func.func @_matmul_kernel(%arg0: i32, %arg1: i32, %arg2: i32, %arg3: memref<256x196xbf16, #tpu.memory_space<vmem>>, %arg4: memref<196x96xbf16, #tpu.memory_space<vmem>>, %arg5: memref<1x96xf32, #tpu.memory_space<vmem>>, %arg6: memref<1x96xf32, #tpu.memory_space<vmem>>, %arg7: memref<256x96xbf16, #tpu.memory_space<vmem>>, %arg8: memref<256x96xf32, #tpu.memory_space<vmem>>) attributes {dimension_semantics = [#tpu.dimension_semantics<parallel>, #tpu.dimension_semantics<parallel>, #tpu.dimension_semantics<arbitrary>], iteration_bounds = array<i64: 2, 1, 1>, scalar_prefetch = 0 : i64, scratch_operands = 1 : i64, tpu.core_type = #tpu.core_type<tc>, window_params = [{transform_indices = @transform_0, window_bounds = array<i64: 256, 196>}, {transform_indices = @transform_1, window_bounds = array<i64: 196, 96>}, {transform_indices = @transform_2, window_bounds = array<i64: 1, 96>}, {transform_indices = @transform_3, window_bounds = array<i64: 1, 96>}, {transform_indices = @transform_4, window_bounds = array<i64: 256, 96>}]} {
    %c0_i32 = arith.constant 0 : i32
    %0 = arith.cmpi eq, %arg2, %c0_i32 : i32
    %1 = arith.extui %0 : i1 to i32
    %c0_i32_0 = arith.constant 0 : i32
    %2 = arith.cmpi ne, %1, %c0_i32_0 : i32
    scf.if %2 {
      %cst_10 = arith.constant 0.000000e+00 : f32
      %12 = vector.broadcast %cst_10 : f32 to vector<256x96xf32>
      %c0_11 = arith.constant 0 : index
      %c0_12 = arith.constant 0 : index
      %13 = vector.load %arg8[%c0_11, %c0_12] : memref<256x96xf32, #tpu.memory_space<vmem>>, vector<256x96xf32>
      tpu.vector_store %arg8[%c0_11, %c0_12], %12 {strides = array<i32>} : memref<256x96xf32, #tpu.memory_space<vmem>>, vector<256x96xf32>,
    } else {
    }
    %c0 = arith.constant 0 : index
    %c0_1 = arith.constant 0 : index
    %3 = vector.load %arg8[%c0, %c0_1] : memref<256x96xf32, #tpu.memory_space<vmem>>, vector<256x96xf32>
    %c0_2 = arith.constant 0 : index
    %c0_3 = arith.constant 0 : index
    %4 = vector.load %arg3[%c0_2, %c0_3] : memref<256x196xbf16, #tpu.memory_space<vmem>>, vector<256x196xbf16>
    %c0_4 = arith.constant 0 : index
    %c0_5 = arith.constant 0 : index
    %5 = vector.load %arg4[%c0_4, %c0_5] : memref<196x96xbf16, #tpu.memory_space<vmem>>, vector<196x96xbf16>
    %cst = arith.constant dense<0.000000e+00> : vector<256x96xf32>
    %6 = tpu.matmul %4, %5, %cst {dimension_numbers = #tpu.dot_dimension_numbers<[1], [0], [0], [1], [0, 0, 1, 1], [], []>} : vector<256x196xbf16>, vector<196x96xbf16>, vector<256x96xf32> -> vector<256x96xf32>
    %7 = arith.addf %3, %6 : vector<256x96xf32>
    %c0_6 = arith.constant 0 : index
    %c0_7 = arith.constant 0 : index
    %8 = vector.load %arg8[%c0_6, %c0_7] : memref<256x96xf32, #tpu.memory_space<vmem>>, vector<256x96xf32>
    tpu.vector_store %arg8[%c0_6, %c0_7], %7 {strides = array<i32>} : memref<256x96xf32, #tpu.memory_space<vmem>>, vector<256x96xf32>,
    %c0_i32_8 = arith.constant 0 : i32
    %9 = arith.cmpi eq, %arg2, %c0_i32_8 : i32
    %10 = arith.extui %9 : i1 to i32
    %c0_i32_9 = arith.constant 0 : i32
    %11 = arith.cmpi ne, %10, %c0_i32_9 : i32
    scf.if %11 {
      %c0_10 = arith.constant 0 : index
      %c0_11 = arith.constant 0 : index
      %12 = vector.load %arg8[%c0_10, %c0_11] : memref<256x96xf32, #tpu.memory_space<vmem>>, vector<256x96xf32>
      %c0_12 = arith.constant 0 : index
      %c0_13 = arith.constant 0 : index
      %13 = vector.load %arg5[%c0_12, %c0_13] : memref<1x96xf32, #tpu.memory_space<vmem>>, vector<1x96xf32>
      %14 = vector.broadcast %13 : vector<1x96xf32> to vector<256x96xf32>
      %15 = arith.mulf %12, %14 : vector<256x96xf32>
      %c0_14 = arith.constant 0 : index
      %c0_15 = arith.constant 0 : index
      %16 = vector.load %arg6[%c0_14, %c0_15] : memref<1x96xf32, #tpu.memory_space<vmem>>, vector<1x96xf32>
      %17 = vector.broadcast %16 : vector<1x96xf32> to vector<256x96xf32>
      %18 = arith.addf %15, %17 : vector<256x96xf32>
      %cst_16 = arith.constant 0.000000e+00 : f32
      %19 = vector.broadcast %cst_16 : f32 to vector<256x96xf32>
      %20 = arith.maximumf %18, %19 : vector<256x96xf32>
      %21 = arith.truncf %20 : vector<256x96xf32> to vector<256x96xbf16>
      %c0_17 = arith.constant 0 : index
      %c0_18 = arith.constant 0 : index
      %22 = vector.load %arg7[%c0_17, %c0_18] : memref<256x96xbf16, #tpu.memory_space<vmem>>, vector<256x96xbf16>
      tpu.vector_store %arg7[%c0_17, %c0_18], %21 {strides = array<i32>} : memref<256x96xbf16, #tpu.memory_space<vmem>>, vector<256x96xbf16>,
    } else {
    }
    return
  }
  func.func @transform_0(%arg0: i32, %arg1: i32, %arg2: i32) -> (i32, i32) {
    %c0_i32 = arith.constant 0 : i32
    return %arg0, %arg2 : i32, i32
  }
  func.func @transform_1(%arg0: i32, %arg1: i32, %arg2: i32) -> (i32, i32) {
    %c0_i32 = arith.constant 0 : i32
    return %arg2, %arg1 : i32, i32
  }
  func.func @transform_2(%arg0: i32, %arg1: i32, %arg2: i32) -> (i32, i32) {
    %c0_i32 = arith.constant 0 : i32
    %c0_i32_0 = arith.constant 0 : i32
    return %c0_i32, %arg1 : i32, i32
  }
  func.func @transform_3(%arg0: i32, %arg1: i32, %arg2: i32) -> (i32, i32) {
    %c0_i32 = arith.constant 0 : i32
    %c0_i32_0 = arith.constant 0 : i32
    return %c0_i32, %arg1 : i32, i32
  }
  func.func @transform_4(%arg0: i32, %arg1: i32, %arg2: i32) -> (i32, i32) {
    %c0_i32 = arith.constant 0 : i32
    return %arg0, %arg1 : i32, i32
  }
}

</mosaic_0001>

<bundles_post_ra>
// kernel: _matmul_call.1
= control target key start
LH: loop header
LB: loop body
LE: loop exit
PB: predicated region body
PF: predicated region fallthrough
CT: control target
= control target key end

     0   :  { %s1672_s15 = smov 0   ;;  %s1674_s16 = smov 0   ;;  %s2028_s0 = inlined_call_operand.vmem [shape: bf16[512,196], index: 0, kind: input, shape index: {}]   ;;  %s2029_s1 = inlined_call_operand.vmem [shape: bf16[196,96], index: 1, kind: input, shape index: {}]   ;;  %s2030_s2 = inlined_call_operand.vmem [shape: f32[1,96], index: 2, kind: input, shape index: {}]   ;;  %s2031_s3 = inlined_call_operand.vmem [shape: f32[1,96], index: 3, kind: input, shape index: {}]   ;;  %s2032_s4 = inlined_call_operand.vmem [shape: bf16[512,96], index: 4, kind: output, shape index: {}]  }
   0x1   :  { %s1676_s17 = smov 0  }
   0x2 LB: > { %s33_s18 = sadd.s32 1, %s1639_s16  ;;  %p1372_p0 = scmp.ge.s32.totalorder %s1643_s17, 1  ;;  %s1643_s17 = sphi %s1676_s17, %s14_s17   ;;  %s1639_s16 = sphi %s1674_s16, %s2034_s16   ;;  %s1635_s15 = sphi %s1672_s15, %s2033_s15  }
   0x3   : > { %p35_p1 = scmp.ge.s32.totalorder %s33_s18, 2  ;;  %p224_p2 = scmp.lt.s32.totalorder %s1643_s17, 3 }
   0x5   : > { %s2036_s18 = smov (%p35_p1, %s33_s18), 0  ;;  %p225_p3 = pnand %p1372_p0, %p224_p2 }
   0x6   : > { %s1373_s23 = sshll.u32 (!%p225_p3), %s1635_s15, 5 }
   0x7   : > { %228 = sbr.rel (%p225_p3) target bundleno = 338 (0x152), region = 36  ;;  %p274_p4 = scmp.lt.s32.totalorder (!%p225_p3), %s1373_s23, 63 }
   0xc   : > { %v1560_v0 = vld [vmem:[%s2029_s1 + $0x38] sm:$0xff]   ;;  %v1645_v1 = vmov 0   ;;  %v1561_v2 = vld [vmem:[%s2029_s1 + $0x30] sm:$0xff]   ;;  %s2038_s23 = smov (!%p274_p4, %s1373_s23), 63  ;;  %v1562_v3 = vld [vmem:[%s2029_s1 + $0x28] sm:$0xff]   ;;  %vm313_vm0 = vcmask 785408  }
   0xd   : > { %707 = vmatprep.subr.bf16.mxu0 %v1645_v1  ;;  %1508 = vmatprep.subr.bf16.mxu1 %v1645_v1  ;;  %s1475_s26 = sshll.u32 %s2038_s23, 3  ;;  %v1563_v4 = vld [vmem:[%s2029_s1 + $0x20] sm:$0xff]   ;;  %vm654_vm1 = vcmask 556032   ;;  %v1646_v6 = vmov 0.0   ;;  %v1564_v7 = vld [vmem:[%s2029_s1 + $0x18] sm:$0xff]   ;;  %v1565_v9 = vld [vmem:[%s2029_s1 + $0x10] sm:$0xff]  }
   0xe   : > { %708 = vmatpush1.bf16.msra.mxu0 %v1560_v0  ;;  %1521 = vmatpush1.bf16.msra.mxu1 %v1560_v0  ;;  %s1714_s5 = scalar_lea.vmem %s2028_s0, %s1475_s26  ;;  %314 = vst.msk [vmem:[#allocation2] sm:$0xff] %vm313_vm0, %v1646_v6  ;;  %315 = vst.msk [vmem:[#allocation2 + $0x8] sm:$0xff] %vm313_vm0, %v1646_v6  ;;  %v1566_v10 = vld [vmem:[%s2029_s1 + $0x8] sm:$0xff]   ;;  %v1567_v11 = vld [vmem:[%s2029_s1] sm:$0xff]   ;;  %vm703_vm2 = vcmask 1041408   ;;  %s1377_s6 = sshll.u32 %s2038_s23, 2 }
   0xf   : > { %709 = vmatprep.subr.bf16.mxu0 %v1645_v1  ;;  %1509 = vmatprep.subr.bf16.mxu1 %v1645_v1  ;;  %v1575_v5 = vld [vmem:[%s1714_s5 + $0x4] ss:$8 sps:$4 sm:$0xff]   ;;  %316 = vst.msk [vmem:[#allocation2 + $0x10] sm:$0xff] %vm313_vm0, %v1646_v6  ;;  %317 = vst.msk [vmem:[#allocation2 + $0x18] sm:$0xff] %vm313_vm0, %v1646_v6  ;;  %v1569_v14 = vld [vmem:[%s2029_s1 + $0x58] sm:$0xff]   ;;  %s1871_s8 = scalar_lea.vmem %s2032_s4, %s1377_s6  ;;  %vm1206_vm3 = vcmask 781312  }
  0x10   : > { %318 = vst.msk [vmem:[#allocation2 + $0x20] sm:$0xff] %vm313_vm0, %v1646_v6  ;;  %319 = vst.msk [vmem:[#allocation2 + $0x28] sm:$0xff] %vm313_vm0, %v1646_v6  ;;  %v1578_v8 = vld [vmem:[%s1714_s5 + $0x84] ss:$8 sps:$4 sm:$0xff]   ;;  %1423 = vmatprep.mubr.msk.bf16.mxu0 %vm654_vm1, %v1575_v5  ;;  %v1570_v15 = vld [vmem:[%s2029_s1 + $0x50] sm:$0xff]  }
  0x11   : > { %320 = vst.msk [vmem:[#allocation2 + $0x30] sm:$0xff] %vm313_vm0, %v1646_v6  ;;  %321 = vst.msk [vmem:[#allocation2 + $0x38] sm:$0xff] %vm313_vm0, %v1646_v6  ;;  %1431 = vmatprep.mubr.msk.bf16.mxu1 %vm654_vm1, %v1578_v8  ;;  %v1568_v12 = vld [vmem:[%s2029_s1 + $0x60] ss:$0 sps:$4 sm:$0x33]   ;;  %v1571_v16 = vld [vmem:[%s2029_s1 + $0x48] sm:$0xff]  }
  0x12   : > { %710 = vmatpush1.bf16.msra.mxu0 %v1561_v2  ;;  %1522 = vmatpush1.bf16.msra.mxu1 %v1561_v2  ;;  %322 = vst.msk [vmem:[#allocation2 + $0x40] sm:$0xff] %vm313_vm0, %v1646_v6  ;;  %323 = vst.msk [vmem:[#allocation2 + $0x48] sm:$0xff] %vm313_vm0, %v1646_v6  ;;  %v705_v13 = vsel %vm703_vm2, %v1568_v12, 0  ;;  %v1572_v17 = vld [vmem:[%s2029_s1 + $0x40] sm:$0xff]   ;;  %v1579_v20 = vld [vmem:[%s1714_s5 + $0x14] ss:$8 sps:$4 sm:$0xff]  }
  0x13   : > { %711 = vmatprep.subr.bf16.mxu0 %v1645_v1  ;;  %1510 = vmatprep.subr.bf16.mxu1 %v1645_v1  ;;  %324 = vst.msk [vmem:[#allocation2 + $0x50] sm:$0xff] %vm313_vm0, %v1646_v6  ;;  %325 = vst.msk [vmem:[#allocation2 + $0x58] sm:$0xff] %vm313_vm0, %v1646_v6  ;;  %v1573_v18 = vld [vmem:[%s1714_s5] ss:$8 sps:$4 sm:$0xff]   ;;  %v1581_v21 = vld [vmem:[%s1714_s5 + $0x94] ss:$8 sps:$4 sm:$0xff]  }
  0x14   : > { %326 = vst.msk [vmem:[#allocation2 + $0x60] sm:$0xff] %vm313_vm0, %v1646_v6  ;;  %327 = vst.msk [vmem:[#allocation2 + $0x68] sm:$0xff] %vm313_vm0, %v1646_v6  ;;  %v1576_v19 = vld [vmem:[%s1714_s5 + $0x80] ss:$8 sps:$4 sm:$0xff]   ;;  %v1583_v22 = vld [vmem:[%s1714_s5 + $0x10] ss:$8 sps:$4 sm:$0xff]  }
  0x15   : > { %328 = vst.msk [vmem:[#allocation2 + $0x70] sm:$0xff] %vm313_vm0, %v1646_v6  ;;  %329 = vst.msk [vmem:[#allocation2 + $0x78] sm:$0xff] %vm313_vm0, %v1646_v6  ;;  %v1584_v23 = vld [vmem:[%s1714_s5 + $0x90] ss:$8 sps:$4 sm:$0xff]   ;;  %v1585_v24 = vld [vmem:[%s1714_s5 + $0x24] ss:$8 sps:$4 sm:$0xff]  }
  0x16   : > { %712 = vmatpush1.bf16.msra.mxu0 %v1562_v3  ;;  %1523 = vmatpush1.bf16.msra.mxu1 %v1562_v3  ;;  %330 = vst.msk [vmem:[#allocation2 + $0x80] sm:$0xff] %vm313_vm0, %v1646_v6  ;;  %331 = vst.msk [vmem:[#allocation2 + $0x88] sm:$0xff] %vm313_vm0, %v1646_v6  ;;  %v1587_v25 = vld [vmem:[%s1714_s5 + $0xa4] ss:$8 sps:$4 sm:$0xff]   ;;  %v1589_v26 = vld [vmem:[%s1714_s5 + $0x20] ss:$8 sps:$4 sm:$0xff]  }
  0x17   : > { %713 = vmatprep.subr.bf16.mxu0 %v1645_v1  ;;  %1511 = vmatprep.subr.bf16.mxu1 %v1645_v1  ;;  %332 = vst.msk [vmem:[#allocation2 + $0x90] sm:$0xff] %vm313_vm0, %v1646_v6  ;;  %333 = vst.msk [vmem:[#allocation2 + $0x98] sm:$0xff] %vm313_vm0, %v1646_v6  ;;  %v1590_v27 = vld [vmem:[%s1714_s5 + $0xa0] ss:$8 sps:$4 sm:$0xff]   ;;  %v1591_v28 = vld [vmem:[%s1714_s5 + $0x34] ss:$8 sps:$4 sm:$0xff]  }
  0x18   : > { %334 = vst.msk [vmem:[#allocation2 + $0xa0] sm:$0xff] %vm313_vm0, %v1646_v6  ;;  %335 = vst.msk [vmem:[#allocation2 + $0xa8] sm:$0xff] %vm313_vm0, %v1646_v6  ;;  %v1593_v29 = vld [vmem:[%s1714_s5 + $0xb4] ss:$8 sps:$4 sm:$0xff]   ;;  %v1595_v30 = vld [vmem:[%s1714_s5 + $0x30] ss:$8 sps:$4 sm:$0xff]  }
  0x19   : > { %336 = vst.msk [vmem:[#allocation2 + $0xb0] sm:$0xff] %vm313_vm0, %v1646_v6  ;;  %337 = vst.msk [vmem:[#allocation2 + $0xb8] sm:$0xff] %vm313_vm0, %v1646_v6  ;;  %v1596_v31 = vld [vmem:[%s1714_s5 + $0xb0] ss:$8 sps:$4 sm:$0xff]   ;;  %v1597_v32 = vld [vmem:[%s1714_s5 + $0x44] ss:$8 sps:$4 sm:$0xff]  }
  0x1a   : > { %338 = vst.msk [vmem:[#allocation2 + $0xc0] sm:$0xff] %vm313_vm0, %v1646_v6  ;;  %339 = vst.msk [vmem:[#allocation2 + $0xc8] sm:$0xff] %vm313_vm0, %v1646_v6  ;;  %714 = vmatpush1.bf16.msra.mxu0 %v1563_v4  ;;  %1524 = vmatpush1.bf16.msra.mxu1 %v1563_v4  ;;  %v1599_v33 = vld [vmem:[%s1714_s5 + $0xc4] ss:$8 sps:$4 sm:$0xff]   ;;  %v1601_v34 = vld [vmem:[%s1714_s5 + $0x40] ss:$8 sps:$4 sm:$0xff]  }
  0x1b   : > { %340 = vst.msk [vmem:[#allocation2 + $0xd0] sm:$0xff] %vm313_vm0, %v1646_v6  ;;  %341 = vst.msk [vmem:[#allocation2 + $0xd8] sm:$0xff] %vm313_vm0, %v1646_v6  ;;  %715 = vmatprep.subr.bf16.mxu0 %v1645_v1  ;;  %1512 = vmatprep.subr.bf16.mxu1 %v1645_v1  ;;  %v1602_v35 = vld [vmem:[%s1714_s5 + $0xc0] ss:$8 sps:$4 sm:$0xff]   ;;  %v1603_v36 = vld [vmem:[%s1714_s5 + $0x54] ss:$8 sps:$4 sm:$0xff]  }
  0x1c   : > { %342 = vst.msk [vmem:[#allocation2 + $0xe0] sm:$0xff] %vm313_vm0, %v1646_v6  ;;  %343 = vst.msk [vmem:[#allocation2 + $0xe8] sm:$0xff] %vm313_vm0, %v1646_v6  ;;  %v1605_v37 = vld [vmem:[%s1714_s5 + $0xd4] ss:$8 sps:$4 sm:$0xff]   ;;  %v1607_v38 = vld [vmem:[%s1714_s5 + $0x50] ss:$8 sps:$4 sm:$0xff]  }
  0x1d   : > { %344 = vst.msk [vmem:[#allocation2 + $0xf0] sm:$0xff] %vm313_vm0, %v1646_v6  ;;  %345 = vst.msk [vmem:[#allocation2 + $0xf8] sm:$0xff] %vm313_vm0, %v1646_v6  ;;  %v1608_v39 = vld [vmem:[%s1714_s5 + $0xd0] ss:$8 sps:$4 sm:$0xff]   ;;  %v1609_v40 = vld [vmem:[%s1714_s5 + $0x64] ss:$8 sps:$4 sm:$0xff]  }
  0x1e   : > { %716 = vmatpush1.bf16.msra.mxu0 %v1564_v7  ;;  %1525 = vmatpush1.bf16.msra.mxu1 %v1564_v7  ;;  %v1611_v41 = vld [vmem:[%s1714_s5 + $0xe4] ss:$8 sps:$4 sm:$0xff]   ;;  %v1613_v42 = vld [vmem:[%s1714_s5 + $0x60] ss:$8 sps:$4 sm:$0xff]   ;;  %v1615_v44 = vld [vmem:[%s1714_s5 + $0x74] ss:$8 sps:$4 sm:$0xff]  }
  0x1f   : > { %717 = vmatprep.subr.bf16.mxu0 %v1645_v1  ;;  %1513 = vmatprep.subr.bf16.mxu1 %v1645_v1  ;;  %v1614_v43 = vld [vmem:[%s1714_s5 + $0xe0] ss:$8 sps:$4 sm:$0xff]   ;;  %v1617_v45 = vld [vmem:[%s1714_s5 + $0xf4] ss:$8 sps:$4 sm:$0xff]   ;;  %v1619_v46 = vld [vmem:[%s1714_s5 + $0x70] ss:$8 sps:$4 sm:$0xff]  }
  0x20   : > { %v1620_v47 = vld [vmem:[%s1714_s5 + $0xf0] ss:$8 sps:$4 sm:$0xff]   ;;  %v346_v48 = vld [vmem:[#allocation2] sm:$0xff]  ;;  %v347_v56 = vld [vmem:[#allocation2 + $0x8] sm:$0xff] }
  0x21   : > { %v362_v49 = vld [vmem:[#allocation2 + $0x80] sm:$0xff]  ;;  %v363_v57 = vld [vmem:[#allocation2 + $0x88] sm:$0xff]  ;;  %v348_v0 = vld [vmem:[#allocation2 + $0x10] sm:$0xff] }
  0x22   : > { %718 = vmatpush1.bf16.msra.mxu0 %v1565_v9  ;;  %1526 = vmatpush1.bf16.msra.mxu1 %v1565_v9  ;;  %v1850_v2 = vld [vmem:[%s2030_s2] ss:$0 sm:$0xff]  ;;  %v349_v8 = vld [vmem:[#allocation2 + $0x18] sm:$0xff] }
  0x23   : > { %719 = vmatprep.subr.bf16.mxu0 %v1645_v1  ;;  %1514 = vmatprep.subr.bf16.mxu1 %v1645_v1  ;;  %v1855_v5 = vld [vmem:[%s2031_s3] ss:$0 sm:$0xff] }
  0x26   : > { %720 = vmatpush1.bf16.msra.mxu0 %v1566_v10  ;;  %1527 = vmatpush1.bf16.msra.mxu1 %v1566_v10 }
  0x27   : > { %721 = vmatprep.subr.bf16.mxu0 %v1645_v1  ;;  %1515 = vmatprep.subr.bf16.mxu1 %v1645_v1 }
  0x2a   : > { %722 = vmatpush1.bf16.msra.mxu0 %v1567_v11  ;;  %1528 = vmatpush1.bf16.msra.mxu1 %v1567_v11 }
  0x2b   : > { %729 = vmatprep.subr.bf16.mxu0 %v1645_v1  ;;  %1516 = vmatprep.subr.bf16.mxu1 %v1645_v1 }
  0x2e   : > { %730 = vmatpush2.bf16.msra.mxu0 %v705_v13  ;;  %1529 = vmatpush2.bf16.msra.mxu1 %v705_v13  ;;  %v365_v13 = vld [vmem:[#allocation2 + $0x98] sm:$0xff] }
  0x2f   : > { %731 = vmatprep.subr.bf16.mxu0 %v1645_v1  ;;  %1517 = vmatprep.subr.bf16.mxu1 %v1645_v1 }
  0x32   : > { %732 = vmatpush2.bf16.msra.mxu0 %v1569_v14  ;;  %1530 = vmatpush2.bf16.msra.mxu1 %v1569_v14 }
  0x33   : > { %733 = vmatprep.subr.bf16.mxu0 %v1645_v1  ;;  %1518 = vmatprep.subr.bf16.mxu1 %v1645_v1 }
  0x36   : > { %734 = vmatpush2.bf16.msra.mxu0 %v1570_v15  ;;  %1531 = vmatpush2.bf16.msra.mxu1 %v1570_v15 }
  0x37   : > { %735 = vmatprep.subr.bf16.mxu0 %v1645_v1  ;;  %1519 = vmatprep.subr.bf16.mxu1 %v1645_v1 }
  0x3a   : > { %736 = vmatpush2.bf16.msra.mxu0 %v1571_v16  ;;  %1532 = vmatpush2.bf16.msra.mxu1 %v1571_v16 }
  0x3b   : > { %737 = vmatprep.subr.bf16.mxu0 %v1645_v1  ;;  %1520 = vmatprep.subr.bf16.mxu1 %v1645_v1  ;;  %v364_v1 = vld [vmem:[#allocation2 + $0x90] sm:$0xff] }
  0x3e   : > { %738 = vmatpush2.bf16.msra.mxu0 %v1572_v17  ;;  %1533 = vmatpush2.bf16.msra.mxu1 %v1572_v17 }
  0x41   : > { %740 = vmatmul.mubr.bf16.vlgmr.msra.gmra.mxu0 %v1573_v18  ;;  %804 = vmatmul.mubr.bf16.vlgmr.msra.gmra.mxu1 %v1576_v19 }
  0x42   : > { %1424 = vmatprep.mubr.msk.bf16.mxu0 %vm654_vm1, %v1579_v20  ;;  %1432 = vmatprep.mubr.msk.bf16.mxu1 %vm654_vm1, %v1581_v21 }
  0x49   : > { %748 = vmatmul.mubr.bf16.gmra.mxu0 %v1583_v22  ;;  %812 = vmatmul.mubr.bf16.gmra.mxu1 %v1584_v23 }
  0x4a   : > { %1425 = vmatprep.mubr.msk.bf16.mxu0 %vm654_vm1, %v1585_v24  ;;  %1433 = vmatprep.mubr.msk.bf16.mxu1 %vm654_vm1, %v1587_v25 }
  0x51   : > { %756 = vmatmul.mubr.bf16.gmra.mxu0 %v1589_v26  ;;  %820 = vmatmul.mubr.bf16.gmra.mxu1 %v1590_v27 }
  0x52   : > { %1426 = vmatprep.mubr.msk.bf16.mxu0 %vm654_vm1, %v1591_v28  ;;  %1434 = vmatprep.mubr.msk.bf16.mxu1 %vm654_vm1, %v1593_v29 }
  0x59   : > { %764 = vmatmul.mubr.bf16.gmra.mxu0 %v1595_v30  ;;  %828 = vmatmul.mubr.bf16.gmra.mxu1 %v1596_v31  ;;  %v350_v30 = vld [vmem:[#allocation2 + $0x20] sm:$0xff] }
  0x5a   : > { %1427 = vmatprep.mubr.msk.bf16.mxu0 %vm654_vm1, %v1597_v32  ;;  %1435 = vmatprep.mubr.msk.bf16.mxu1 %vm654_vm1, %v1599_v33  ;;  %v366_v31 = vld [vmem:[#allocation2 + $0xa0] sm:$0xff] }
  0x61   : > { %772 = vmatmul.mubr.bf16.gmra.mxu0 %v1601_v34  ;;  %836 = vmatmul.mubr.bf16.gmra.mxu1 %v1602_v35 }
  0x62   : > { %1428 = vmatprep.mubr.msk.bf16.mxu0 %vm654_vm1, %v1603_v36  ;;  %1436 = vmatprep.mubr.msk.bf16.mxu1 %vm654_vm1, %v1605_v37 }
  0x69   : > { %780 = vmatmul.mubr.bf16.gmra.mxu0 %v1607_v38  ;;  %844 = vmatmul.mubr.bf16.gmra.mxu1 %v1608_v39 }
  0x6a   : > { %1429 = vmatprep.mubr.msk.bf16.mxu0 %vm654_vm1, %v1609_v40  ;;  %1437 = vmatprep.mubr.msk.bf16.mxu1 %vm654_vm1, %v1611_v41 }
  0x71   : > { %788 = vmatmul.mubr.bf16.gmra.mxu0 %v1613_v42  ;;  %852 = vmatmul.mubr.bf16.gmra.mxu1 %v1614_v43 }
  0x72   : > { %1430 = vmatprep.mubr.msk.bf16.mxu0 %vm654_vm1, %v1615_v44  ;;  %1438 = vmatprep.mubr.msk.bf16.mxu1 %vm654_vm1, %v1617_v45 }
  0x79   : > { %796 = vmatmul.mubr.bf16.gmra.mxu0 %v1619_v46  ;;  %860 = vmatmul.mubr.bf16.gmra.mxu1 %v1620_v47 }
 0x101   : > { %v741_v50 = vpop.f32.mrf.mxu0  ;;  %v805_v51 = vpop.f32.mrf.mxu1 }
 0x102   : > { %v868_v52 = vadd.f32 %v741_v50, %v346_v48  ;;  %v884_v53 = vadd.f32 %v805_v51, %v362_v49  ;;  %v351_v48 = vld [vmem:[#allocation2 + $0x28] sm:$0xff] }
 0x103   : > { %v743_v54 = vpop.f32.mrf.mxu0  ;;  %v807_v55 = vpop.f32.mrf.mxu1  ;;  %v367_v49 = vld [vmem:[#allocation2 + $0xa8] sm:$0xff] }
 0x104   : > { %901 = vst.msk [vmem:[#allocation2] sm:$0xff] %vm313_vm0, %v868_v52  ;;  %917 = vst.msk [vmem:[#allocation2 + $0x80] sm:$0xff] %vm313_vm0, %v884_v53 }
 0x105   : > { %v744_v58 = vpop.f32.mrf.mxu0  ;;  %v808_v59 = vpop.f32.mrf.mxu1 }
 0x106   : > { %v869_v60 = vadd.f32 %v744_v58, %v347_v56  ;;  %v885_v61 = vadd.f32 %v808_v59, %v363_v57 }
 0x107   : > { %v746_v62 = vpop.f32.mrf.mxu0  ;;  %v810_v63 = vpop.f32.mrf.mxu1 }
 0x108   : > { %902 = vst.msk [vmem:[#allocation2 + $0x8] sm:$0xff] %vm313_vm0, %v869_v60  ;;  %918 = vst.msk [vmem:[#allocation2 + $0x88] sm:$0xff] %vm313_vm0, %v885_v61 }
 0x109   : > { %v749_v3 = vpop.f32.mrf.mxu0  ;;  %v813_v4 = vpop.f32.mrf.mxu1 }
 0x10a   : > { %v870_v6 = vadd.f32 %v749_v3, %v348_v0  ;;  %v886_v7 = vadd.f32 %v813_v4, %v364_v1  ;;  %v352_v3 = vld [vmem:[#allocation2 + $0x30] sm:$0xff] }
 0x10b   : > { %v936_v9 = vld [vmem:[#allocation2] sm:$0xff]  ;;  %v751_v11 = vpop.f32.mrf.mxu0  ;;  %v815_v12 = vpop.f32.mrf.mxu1  ;;  %v368_v4 = vld [vmem:[#allocation2 + $0xb0] sm:$0xff] }
 0x10c   : > { %v952_v10 = vld [vmem:[#allocation2 + $0x80] sm:$0xff]  ;;  %v975_v14 = vmul.f32 %v1850_v2, %v936_v9  ;;  %903 = vst.msk [vmem:[#allocation2 + $0x10] sm:$0xff] %vm313_vm0, %v870_v6  ;;  %919 = vst.msk [vmem:[#allocation2 + $0x90] sm:$0xff] %vm313_vm0, %v886_v7 }
 0x10d   : > { %v991_v15 = vmul.f32 %v1850_v2, %v952_v10  ;;  %v752_v16 = vpop.f32.mrf.mxu0  ;;  %v816_v17 = vpop.f32.mrf.mxu1 }
 0x10e   : > { %v1014_v18 = vadd.f32 %v1855_v5, %v975_v14  ;;  %v871_v20 = vadd.f32 %v752_v16, %v349_v8  ;;  %v887_v21 = vadd.f32 %v816_v17, %v365_v13  ;;  %v353_v16 = vld [vmem:[#allocation2 + $0x38] sm:$0xff] }
 0x10f   : > { %v1030_v19 = vadd.f32 %v1855_v5, %v991_v15  ;;  %v937_v22 = vld [vmem:[#allocation2 + $0x8] sm:$0xff]  ;;  %v754_v24 = vpop.f32.mrf.mxu0  ;;  %v818_v25 = vpop.f32.mrf.mxu1  ;;  %v369_v17 = vld [vmem:[#allocation2 + $0xb8] sm:$0xff] }
 0x110   : > { %v953_v23 = vld [vmem:[#allocation2 + $0x88] sm:$0xff]  ;;  %v1046_v26 = vmax.f32 %v1014_v18, 0.0  ;;  %v976_v28 = vmul.f32 %v1850_v2, %v937_v22  ;;  %904 = vst.msk [vmem:[#allocation2 + $0x18] sm:$0xff] %vm313_vm0, %v871_v20  ;;  %920 = vst.msk [vmem:[#allocation2 + $0x98] sm:$0xff] %vm313_vm0, %v887_v21 }
 0x111   : > { %v1062_v27 = vmax.f32 %v1030_v19, 0.0  ;;  %v992_v29 = vmul.f32 %v1850_v2, %v953_v23  ;;  %v757_v32 = vpop.f32.mrf.mxu0  ;;  %v821_v33 = vpop.f32.mrf.mxu1 }
 0x112   : > { %v1476_v34 = vpack.c.bf16 %v1046_v26, %v1046_v26  ;;  %v1015_v36 = vadd.f32 %v1855_v5, %v976_v28  ;;  %v872_v40 = vadd.f32 %v757_v32, %v350_v30  ;;  %v888_v41 = vadd.f32 %v821_v33, %v366_v31 }
 0x113   : > { %v1492_v35 = vpack.c.bf16 %v1062_v27, %v1062_v27  ;;  %v1031_v37 = vadd.f32 %v1855_v5, %v992_v29  ;;  %v938_v38 = vld [vmem:[#allocation2 + $0x10] sm:$0xff]  ;;  %v759_v42 = vpop.f32.mrf.mxu0  ;;  %v823_v43 = vpop.f32.mrf.mxu1 }
 0x114   : > { %v954_v39 = vld [vmem:[#allocation2 + $0x90] sm:$0xff]  ;;  %1207 = vst.msk [vmem:[%s1871_s8] sm:$0xf] %vm1206_vm3, %v1476_v34  ;;  %v1047_v44 = vmax.f32 %v1015_v36, 0.0  ;;  %v977_v46 = vmul.f32 %v1850_v2, %v938_v38  ;;  %v354_v34 = vld [vmem:[#allocation2 + $0x40] sm:$0xff] }
 0x115   : > { %1223 = vst.msk [vmem:[%s1871_s8 + $0x40] sm:$0xf] %vm1206_vm3, %v1492_v35  ;;  %v1063_v45 = vmax.f32 %v1031_v37, 0.0  ;;  %v993_v47 = vmul.f32 %v1850_v2, %v954_v39  ;;  %v760_v50 = vpop.f32.mrf.mxu0  ;;  %v824_v51 = vpop.f32.mrf.mxu1  ;;  %v370_v35 = vld [vmem:[#allocation2 + $0xc0] sm:$0xff] }
 0x116   : > { %905 = vst.msk [vmem:[#allocation2 + $0x20] sm:$0xff] %vm313_vm0, %v872_v40  ;;  %921 = vst.msk [vmem:[#allocation2 + $0xa0] sm:$0xff] %vm313_vm0, %v888_v41  ;;  %v1477_v52 = vpack.c.bf16 %v1047_v44, %v1047_v44  ;;  %v1016_v54 = vadd.f32 %v1855_v5, %v977_v46  ;;  %v873_v58 = vadd.f32 %v760_v50, %v351_v48 }
 0x117   : > { %v1493_v53 = vpack.c.bf16 %v1063_v45, %v1063_v45  ;;  %v1032_v55 = vadd.f32 %v1855_v5, %v993_v47  ;;  %v939_v56 = vld [vmem:[#allocation2 + $0x18] sm:$0xff]  ;;  %v889_v59 = vadd.f32 %v824_v51, %v367_v49  ;;  %v762_v60 = vpop.f32.mrf.mxu0  ;;  %v826_v61 = vpop.f32.mrf.mxu1 }
 0x118   : > { %v955_v57 = vld [vmem:[#allocation2 + $0x98] sm:$0xff]  ;;  %1208 = vst.msk [vmem:[%s1871_s8 + $0x4] sm:$0xf] %vm1206_vm3, %v1477_v52  ;;  %v1048_v62 = vmax.f32 %v1016_v54, 0.0  ;;  %v978_v0 = vmul.f32 %v1850_v2, %v939_v56  ;;  %v355_v52 = vld [vmem:[#allocation2 + $0x48] sm:$0xff] }
 0x119   : > { %1224 = vst.msk [vmem:[%s1871_s8 + $0x44] sm:$0xf] %vm1206_vm3, %v1493_v53  ;;  %v1064_v63 = vmax.f32 %v1032_v55, 0.0  ;;  %v994_v1 = vmul.f32 %v1850_v2, %v955_v57  ;;  %v765_v6 = vpop.f32.mrf.mxu0  ;;  %v829_v7 = vpop.f32.mrf.mxu1  ;;  %v371_v53 = vld [vmem:[#allocation2 + $0xc8] sm:$0xff] }
 0x11a   : > { %906 = vst.msk [vmem:[#allocation2 + $0x28] sm:$0xff] %vm313_vm0, %v873_v58  ;;  %922 = vst.msk [vmem:[#allocation2 + $0xa8] sm:$0xff] %vm313_vm0, %v889_v59  ;;  %v1478_v8 = vpack.c.bf16 %v1048_v62, %v1048_v62  ;;  %v1017_v10 = vadd.f32 %v1855_v5, %v978_v0  ;;  %v874_v12 = vadd.f32 %v765_v6, %v352_v3  ;;  %v356_v0 = vld [vmem:[#allocation2 + $0x50] sm:$0xff] }
 0x11b   : > { %v1494_v9 = vpack.c.bf16 %v1064_v63, %v1064_v63  ;;  %v1033_v11 = vadd.f32 %v1855_v5, %v994_v1  ;;  %v890_v13 = vadd.f32 %v829_v7, %v368_v4  ;;  %v767_v14 = vpop.f32.mrf.mxu0  ;;  %v831_v15 = vpop.f32.mrf.mxu1 }
 0x11c   : > { %1209 = vst.msk [vmem:[%s1871_s8 + $0x8] sm:$0xf] %vm1206_vm3, %v1478_v8  ;;  %v1049_v18 = vmax.f32 %v1017_v10, 0.0 }
 0x11d   : > { %1225 = vst.msk [vmem:[%s1871_s8 + $0x48] sm:$0xf] %vm1206_vm3, %v1494_v9  ;;  %v1065_v19 = vmax.f32 %v1033_v11, 0.0  ;;  %v940_v20 = vld [vmem:[#allocation2 + $0x20] sm:$0xff]  ;;  %v768_v24 = vpop.f32.mrf.mxu0  ;;  %v832_v25 = vpop.f32.mrf.mxu1  ;;  %v372_v11 = vld [vmem:[#allocation2 + $0xd0] sm:$0xff] }
 0x11e   : > { %v956_v21 = vld [vmem:[#allocation2 + $0xa0] sm:$0xff]  ;;  %v979_v22 = vmul.f32 %v1850_v2, %v940_v20  ;;  %907 = vst.msk [vmem:[#allocation2 + $0x30] sm:$0xff] %vm313_vm0, %v874_v12  ;;  %923 = vst.msk [vmem:[#allocation2 + $0xb0] sm:$0xff] %vm313_vm0, %v890_v13  ;;  %v1479_v26 = vpack.c.bf16 %v1049_v18, %v1049_v18  ;;  %v875_v28 = vadd.f32 %v768_v24, %v353_v16 }
 0x11f   : > { %v995_v23 = vmul.f32 %v1850_v2, %v956_v21  ;;  %v1495_v27 = vpack.c.bf16 %v1065_v19, %v1065_v19  ;;  %v891_v29 = vadd.f32 %v832_v25, %v369_v17  ;;  %v770_v32 = vpop.f32.mrf.mxu0  ;;  %v834_v33 = vpop.f32.mrf.mxu1 }
 0x120   : > { %v1018_v30 = vadd.f32 %v1855_v5, %v979_v22  ;;  %1210 = vst.msk [vmem:[%s1871_s8 + $0xc] sm:$0xf] %vm1206_vm3, %v1479_v26  ;;  %v357_v32 = vld [vmem:[#allocation2 + $0x58] sm:$0xff] }
 0x121   : > { %v1034_v31 = vadd.f32 %v1855_v5, %v995_v23  ;;  %1226 = vst.msk [vmem:[%s1871_s8 + $0x4c] sm:$0xf] %vm1206_vm3, %v1495_v27  ;;  %v941_v36 = vld [vmem:[#allocation2 + $0x28] sm:$0xff]  ;;  %v773_v42 = vpop.f32.mrf.mxu0  ;;  %v837_v43 = vpop.f32.mrf.mxu1  ;;  %v373_v33 = vld [vmem:[#allocation2 + $0xd8] sm:$0xff] }
 0x122   : > { %v957_v37 = vld [vmem:[#allocation2 + $0xa8] sm:$0xff]  ;;  %908 = vst.msk [vmem:[#allocation2 + $0x38] sm:$0xff] %vm313_vm0, %v875_v28  ;;  %924 = vst.msk [vmem:[#allocation2 + $0xb8] sm:$0xff] %vm313_vm0, %v891_v29  ;;  %v1050_v38 = vmax.f32 %v1018_v30, 0.0  ;;  %v980_v40 = vmul.f32 %v1850_v2, %v941_v36  ;;  %v876_v44 = vadd.f32 %v773_v42, %v354_v34  ;;  %v892_v45 = vadd.f32 %v837_v43, %v370_v35 }
 0x123   : > { %v1066_v39 = vmax.f32 %v1034_v31, 0.0  ;;  %v996_v41 = vmul.f32 %v1850_v2, %v957_v37  ;;  %v775_v50 = vpop.f32.mrf.mxu0  ;;  %v839_v51 = vpop.f32.mrf.mxu1 }
 0x124   : > { %v1480_v46 = vpack.c.bf16 %v1050_v38, %v1050_v38  ;;  %v1019_v48 = vadd.f32 %v1855_v5, %v980_v40  ;;  %909 = vst.msk [vmem:[#allocation2 + $0x40] sm:$0xff] %vm313_vm0, %v876_v44  ;;  %925 = vst.msk [vmem:[#allocation2 + $0xc0] sm:$0xff] %vm313_vm0, %v892_v45  ;;  %v358_v50 = vld [vmem:[#allocation2 + $0x60] sm:$0xff] }
 0x125   : > { %v1496_v47 = vpack.c.bf16 %v1066_v39, %v1066_v39  ;;  %v1035_v49 = vadd.f32 %v1855_v5, %v996_v41  ;;  %v942_v54 = vld [vmem:[#allocation2 + $0x30] sm:$0xff]  ;;  %v776_v60 = vpop.f32.mrf.mxu0  ;;  %v840_v61 = vpop.f32.mrf.mxu1  ;;  %v374_v51 = vld [vmem:[#allocation2 + $0xe0] sm:$0xff] }
 0x126   : > { %v958_v55 = vld [vmem:[#allocation2 + $0xb0] sm:$0xff]  ;;  %1211 = vst.msk [vmem:[%s1871_s8 + $0x10] sm:$0xf] %vm1206_vm3, %v1480_v46  ;;  %v1051_v56 = vmax.f32 %v1019_v48, 0.0  ;;  %v981_v58 = vmul.f32 %v1850_v2, %v942_v54  ;;  %v877_v62 = vadd.f32 %v776_v60, %v355_v52  ;;  %v893_v63 = vadd.f32 %v840_v61, %v371_v53 }
 0x127   : > { %1227 = vst.msk [vmem:[%s1871_s8 + $0x50] sm:$0xf] %vm1206_vm3, %v1496_v47  ;;  %v1067_v57 = vmax.f32 %v1035_v49, 0.0  ;;  %v997_v59 = vmul.f32 %v1850_v2, %v958_v55  ;;  %v778_v9 = vpop.f32.mrf.mxu0  ;;  %v842_v10 = vpop.f32.mrf.mxu1 }
 0x128   : > { %v1481_v1 = vpack.c.bf16 %v1051_v56, %v1051_v56  ;;  %v1020_v4 = vadd.f32 %v1855_v5, %v981_v58  ;;  %910 = vst.msk [vmem:[#allocation2 + $0x48] sm:$0xff] %vm313_vm0, %v877_v62  ;;  %926 = vst.msk [vmem:[#allocation2 + $0xc8] sm:$0xff] %vm313_vm0, %v893_v63 }
 0x129   : > { %v1497_v3 = vpack.c.bf16 %v1067_v57, %v1067_v57  ;;  %v1036_v6 = vadd.f32 %v1855_v5, %v997_v59  ;;  %v943_v7 = vld [vmem:[#allocation2 + $0x38] sm:$0xff]  ;;  %v781_v16 = vpop.f32.mrf.mxu0  ;;  %v845_v17 = vpop.f32.mrf.mxu1 }
 0x12a   : > { %v959_v8 = vld [vmem:[#allocation2 + $0xb8] sm:$0xff]  ;;  %v982_v12 = vmul.f32 %v1850_v2, %v943_v7  ;;  %1212 = vst.msk [vmem:[%s1871_s8 + $0x14] sm:$0xf] %vm1206_vm3, %v1481_v1  ;;  %v1052_v14 = vmax.f32 %v1020_v4, 0.0  ;;  %v878_v20 = vadd.f32 %v781_v16, %v356_v0  ;;  %v894_v21 = vadd.f32 %v845_v17, %v372_v11  ;;  %v375_v7 = vld [vmem:[#allocation2 + $0xe8] sm:$0xff] }
 0x12b   : > { %v998_v13 = vmul.f32 %v1850_v2, %v959_v8  ;;  %1228 = vst.msk [vmem:[%s1871_s8 + $0x54] sm:$0xf] %vm1206_vm3, %v1497_v3  ;;  %v1068_v15 = vmax.f32 %v1036_v6, 0.0  ;;  %v944_v24 = vld [vmem:[#allocation2 + $0x40] sm:$0xff]  ;;  %v783_v26 = vpop.f32.mrf.mxu0  ;;  %v847_v27 = vpop.f32.mrf.mxu1  ;;  %v359_v6 = vld [vmem:[#allocation2 + $0x68] sm:$0xff] }
 0x12c   : > { %v1021_v18 = vadd.f32 %v1855_v5, %v982_v12  ;;  %v1482_v22 = vpack.c.bf16 %v1052_v14, %v1052_v14  ;;  %v960_v25 = vld [vmem:[#allocation2 + $0xc0] sm:$0xff]  ;;  %v983_v30 = vmul.f32 %v1850_v2, %v944_v24  ;;  %911 = vst.msk [vmem:[#allocation2 + $0x50] sm:$0xff] %vm313_vm0, %v878_v20  ;;  %927 = vst.msk [vmem:[#allocation2 + $0xd0] sm:$0xff] %vm313_vm0, %v894_v21 }
 0x12d   : > { %v1037_v19 = vadd.f32 %v1855_v5, %v998_v13  ;;  %v1498_v23 = vpack.c.bf16 %v1068_v15, %v1068_v15  ;;  %v999_v31 = vmul.f32 %v1850_v2, %v960_v25  ;;  %v784_v34 = vpop.f32.mrf.mxu0  ;;  %v848_v35 = vpop.f32.mrf.mxu1 }
 0x12e   : > { %v1053_v28 = vmax.f32 %v1021_v18, 0.0  ;;  %1213 = vst.msk [vmem:[%s1871_s8 + $0x18] sm:$0xf] %vm1206_vm3, %v1482_v22  ;;  %v1022_v38 = vadd.f32 %v1855_v5, %v983_v30  ;;  %v879_v42 = vadd.f32 %v784_v34, %v357_v32  ;;  %v895_v43 = vadd.f32 %v848_v35, %v373_v33  ;;  %v360_v18 = vld [vmem:[#allocation2 + $0x70] sm:$0xff] }
 0x12f   : > { %v1069_v29 = vmax.f32 %v1037_v19, 0.0  ;;  %1229 = vst.msk [vmem:[%s1871_s8 + $0x58] sm:$0xf] %vm1206_vm3, %v1498_v23  ;;  %v1038_v39 = vadd.f32 %v1855_v5, %v999_v31  ;;  %v945_v40 = vld [vmem:[#allocation2 + $0x48] sm:$0xff]  ;;  %v786_v44 = vpop.f32.mrf.mxu0  ;;  %v850_v45 = vpop.f32.mrf.mxu1  ;;  %v376_v19 = vld [vmem:[#allocation2 + $0xf0] sm:$0xff] }
 0x130   : > { %v1483_v36 = vpack.c.bf16 %v1053_v28, %v1053_v28  ;;  %v961_v41 = vld [vmem:[#allocation2 + $0xc8] sm:$0xff]  ;;  %v1054_v46 = vmax.f32 %v1022_v38, 0.0  ;;  %v984_v48 = vmul.f32 %v1850_v2, %v945_v40  ;;  %912 = vst.msk [vmem:[#allocation2 + $0x58] sm:$0xff] %vm313_vm0, %v879_v42  ;;  %928 = vst.msk [vmem:[#allocation2 + $0xd8] sm:$0xff] %vm313_vm0, %v895_v43 }
 0x131   : > { %v1499_v37 = vpack.c.bf16 %v1069_v29, %v1069_v29  ;;  %v1070_v47 = vmax.f32 %v1038_v39, 0.0  ;;  %v1000_v49 = vmul.f32 %v1850_v2, %v961_v41  ;;  %v789_v52 = vpop.f32.mrf.mxu0  ;;  %v853_v53 = vpop.f32.mrf.mxu1 }
 0x132   : > { %1214 = vst.msk [vmem:[%s1871_s8 + $0x1c] sm:$0xf] %vm1206_vm3, %v1483_v36  ;;  %v1484_v54 = vpack.c.bf16 %v1054_v46, %v1054_v46  ;;  %v1023_v56 = vadd.f32 %v1855_v5, %v984_v48  ;;  %v880_v60 = vadd.f32 %v789_v52, %v358_v50  ;;  %v896_v61 = vadd.f32 %v853_v53, %v374_v51  ;;  %v361_v36 = vld [vmem:[#allocation2 + $0x78] sm:$0xff] }
 0x133   : > { %1230 = vst.msk [vmem:[%s1871_s8 + $0x5c] sm:$0xf] %vm1206_vm3, %v1499_v37  ;;  %v1500_v55 = vpack.c.bf16 %v1070_v47, %v1070_v47  ;;  %v1039_v57 = vadd.f32 %v1855_v5, %v1000_v49  ;;  %v946_v58 = vld [vmem:[#allocation2 + $0x50] sm:$0xff]  ;;  %v791_v62 = vpop.f32.mrf.mxu0  ;;  %v855_v63 = vpop.f32.mrf.mxu1  ;;  %v377_v37 = vld [vmem:[#allocation2 + $0xf8] sm:$0xff] }
 0x134   : > { %v962_v59 = vld [vmem:[#allocation2 + $0xd0] sm:$0xff]  ;;  %1215 = vst.msk [vmem:[%s1871_s8 + $0x20] sm:$0xf] %vm1206_vm3, %v1484_v54  ;;  %v1055_v0 = vmax.f32 %v1023_v56, 0.0  ;;  %v985_v3 = vmul.f32 %v1850_v2, %v946_v58 }
 0x135   : > { %1231 = vst.msk [vmem:[%s1871_s8 + $0x60] sm:$0xf] %vm1206_vm3, %v1500_v55  ;;  %v1071_v1 = vmax.f32 %v1039_v57, 0.0  ;;  %v1001_v4 = vmul.f32 %v1850_v2, %v962_v59  ;;  %v792_v8 = vpop.f32.mrf.mxu0  ;;  %v856_v9 = vpop.f32.mrf.mxu1 }
 0x136   : > { %913 = vst.msk [vmem:[#allocation2 + $0x60] sm:$0xff] %vm313_vm0, %v880_v60  ;;  %929 = vst.msk [vmem:[#allocation2 + $0xe0] sm:$0xff] %vm313_vm0, %v896_v61  ;;  %v1485_v10 = vpack.c.bf16 %v1055_v0, %v1055_v0  ;;  %v1024_v12 = vadd.f32 %v1855_v5, %v985_v3  ;;  %v881_v14 = vadd.f32 %v792_v8, %v359_v6 }
 0x137   : > { %v1501_v11 = vpack.c.bf16 %v1071_v1, %v1071_v1  ;;  %v1040_v13 = vadd.f32 %v1855_v5, %v1001_v4  ;;  %v897_v15 = vadd.f32 %v856_v9, %v375_v7  ;;  %v794_v16 = vpop.f32.mrf.mxu0  ;;  %v858_v17 = vpop.f32.mrf.mxu1  ;;  %v947_v22 = vld [vmem:[#allocation2 + $0x58] sm:$0xff] }
 0x138   : > { %1216 = vst.msk [vmem:[%s1871_s8 + $0x24] sm:$0xf] %vm1206_vm3, %v1485_v10  ;;  %v1056_v20 = vmax.f32 %v1024_v12, 0.0  ;;  %v963_v23 = vld [vmem:[#allocation2 + $0xd8] sm:$0xff]  ;;  %v986_v24 = vmul.f32 %v1850_v2, %v947_v22 }
 0x139   : > { %1232 = vst.msk [vmem:[%s1871_s8 + $0x64] sm:$0xf] %vm1206_vm3, %v1501_v11  ;;  %v1072_v21 = vmax.f32 %v1040_v13, 0.0  ;;  %v1002_v25 = vmul.f32 %v1850_v2, %v963_v23  ;;  %v797_v26 = vpop.f32.mrf.mxu0  ;;  %v861_v27 = vpop.f32.mrf.mxu1 }
 0x13a   : > { %914 = vst.msk [vmem:[#allocation2 + $0x68] sm:$0xff] %vm313_vm0, %v881_v14  ;;  %930 = vst.msk [vmem:[#allocation2 + $0xe8] sm:$0xff] %vm313_vm0, %v897_v15  ;;  %v1486_v28 = vpack.c.bf16 %v1056_v20, %v1056_v20  ;;  %v882_v30 = vadd.f32 %v797_v26, %v360_v18  ;;  %v898_v31 = vadd.f32 %v861_v27, %v376_v19 }
 0x13b   : > { %v1502_v29 = vpack.c.bf16 %v1072_v21, %v1072_v21  ;;  %v1025_v32 = vadd.f32 %v1855_v5, %v986_v24  ;;  %v1041_v33 = vadd.f32 %v1855_v5, %v1002_v25  ;;  %v799_v34 = vpop.f32.mrf.mxu0  ;;  %v863_v35 = vpop.f32.mrf.mxu1 }
 0x13c   : > { %1217 = vst.msk [vmem:[%s1871_s8 + $0x28] sm:$0xf] %vm1206_vm3, %v1486_v28 }
 0x13d   : > { %1233 = vst.msk [vmem:[%s1871_s8 + $0x68] sm:$0xf] %vm1206_vm3, %v1502_v29  ;;  %v948_v38 = vld [vmem:[#allocation2 + $0x60] sm:$0xff]  ;;  %v1057_v40 = vmax.f32 %v1025_v32, 0.0  ;;  %v1073_v41 = vmax.f32 %v1041_v33, 0.0  ;;  %v800_v44 = vpop.f32.mrf.mxu0  ;;  %v864_v45 = vpop.f32.mrf.mxu1 }
 0x13e   : > { %v964_v39 = vld [vmem:[#allocation2 + $0xe0] sm:$0xff]  ;;  %915 = vst.msk [vmem:[#allocation2 + $0x70] sm:$0xff] %vm313_vm0, %v882_v30  ;;  %931 = vst.msk [vmem:[#allocation2 + $0xf0] sm:$0xff] %vm313_vm0, %v898_v31  ;;  %v987_v42 = vmul.f32 %v1850_v2, %v948_v38  ;;  %v883_v46 = vadd.f32 %v800_v44, %v361_v36  ;;  %v899_v47 = vadd.f32 %v864_v45, %v377_v37 }
 0x13f   : > { %v1003_v43 = vmul.f32 %v1850_v2, %v964_v39  ;;  %v1487_v48 = vpack.c.bf16 %v1057_v40, %v1057_v40  ;;  %v1503_v49 = vpack.c.bf16 %v1073_v41, %v1073_v41  ;;  %v802_v52 = vpop.f32.mrf.mxu0  ;;  %v866_v53 = vpop.f32.mrf.mxu1 }
 0x140   : > { %v1026_v50 = vadd.f32 %v1855_v5, %v987_v42  ;;  %916 = vst.msk [vmem:[#allocation2 + $0x78] sm:$0xff] %vm313_vm0, %v883_v46  ;;  %932 = vst.msk [vmem:[#allocation2 + $0xf8] sm:$0xff] %vm313_vm0, %v899_v47 }
 0x141   : > { %v1042_v51 = vadd.f32 %v1855_v5, %v1003_v43  ;;  %v949_v54 = vld [vmem:[#allocation2 + $0x68] sm:$0xff]  ;;  %1218 = vst.msk [vmem:[%s1871_s8 + $0x2c] sm:$0xf] %vm1206_vm3, %v1487_v48  ;;  %1234 = vst.msk [vmem:[%s1871_s8 + $0x6c] sm:$0xf] %vm1206_vm3, %v1503_v49 }
 0x142   : > { %v965_v55 = vld [vmem:[#allocation2 + $0xe8] sm:$0xff]  ;;  %v1058_v56 = vmax.f32 %v1026_v50, 0.0  ;;  %v988_v58 = vmul.f32 %v1850_v2, %v949_v54 }
 0x143   : > { %v1074_v57 = vmax.f32 %v1042_v51, 0.0  ;;  %v1004_v59 = vmul.f32 %v1850_v2, %v965_v55 }
 0x144   : > { %v1488_v60 = vpack.c.bf16 %v1058_v56, %v1058_v56  ;;  %v1027_v62 = vadd.f32 %v1855_v5, %v988_v58 }
 0x145   : > { %v1504_v61 = vpack.c.bf16 %v1074_v57, %v1074_v57  ;;  %v1043_v63 = vadd.f32 %v1855_v5, %v1004_v59  ;;  %v950_v0 = vld [vmem:[#allocation2 + $0x70] sm:$0xff] }
 0x146   : > { %v966_v1 = vld [vmem:[#allocation2 + $0xf0] sm:$0xff]  ;;  %v989_v3 = vmul.f32 %v1850_v2, %v950_v0  ;;  %1219 = vst.msk [vmem:[%s1871_s8 + $0x30] sm:$0xf] %vm1206_vm3, %v1488_v60  ;;  %v1059_v6 = vmax.f32 %v1027_v62, 0.0 }
 0x147   : > { %v1005_v4 = vmul.f32 %v1850_v2, %v966_v1  ;;  %1235 = vst.msk [vmem:[%s1871_s8 + $0x70] sm:$0xf] %vm1206_vm3, %v1504_v61  ;;  %v1075_v7 = vmax.f32 %v1043_v63, 0.0  ;;  %v951_v12 = vld [vmem:[#allocation2 + $0x78] sm:$0xff] }
 0x148   : > { %v1028_v8 = vadd.f32 %v1855_v5, %v989_v3  ;;  %v1489_v10 = vpack.c.bf16 %v1059_v6, %v1059_v6  ;;  %v967_v13 = vld [vmem:[#allocation2 + $0xf8] sm:$0xff]  ;;  %v990_v16 = vmul.f32 %v1850_v2, %v951_v12 }
 0x149   : > { %v1044_v9 = vadd.f32 %v1855_v5, %v1005_v4  ;;  %v1505_v11 = vpack.c.bf16 %v1075_v7, %v1075_v7  ;;  %v1006_v17 = vmul.f32 %v1850_v2, %v967_v13 }
 0x14a   : > { %v1060_v14 = vmax.f32 %v1028_v8, 0.0  ;;  %1220 = vst.msk [vmem:[%s1871_s8 + $0x34] sm:$0xf] %vm1206_vm3, %v1489_v10  ;;  %v1029_v20 = vadd.f32 %v1855_v5, %v990_v16 }
 0x14b   : > { %v1076_v15 = vmax.f32 %v1044_v9, 0.0  ;;  %1236 = vst.msk [vmem:[%s1871_s8 + $0x74] sm:$0xf] %vm1206_vm3, %v1505_v11  ;;  %v1045_v21 = vadd.f32 %v1855_v5, %v1006_v17 }
 0x14c   : > { %v1490_v18 = vpack.c.bf16 %v1060_v14, %v1060_v14  ;;  %v1061_v22 = vmax.f32 %v1029_v20, 0.0 }
 0x14d   : > { %v1506_v19 = vpack.c.bf16 %v1076_v15, %v1076_v15  ;;  %v1077_v23 = vmax.f32 %v1045_v21, 0.0 }
 0x14e   : > { %1221 = vst.msk [vmem:[%s1871_s8 + $0x38] sm:$0xf] %vm1206_vm3, %v1490_v18  ;;  %v1491_v24 = vpack.c.bf16 %v1061_v22, %v1061_v22 }
 0x14f   : > { %1237 = vst.msk [vmem:[%s1871_s8 + $0x78] sm:$0xf] %vm1206_vm3, %v1506_v19  ;;  %v1507_v25 = vpack.c.bf16 %v1077_v23, %v1077_v23 }
 0x150   : > { %1222 = vst.msk [vmem:[%s1871_s8 + $0x3c] sm:$0xf] %vm1206_vm3, %v1491_v24 }
 0x151   : > { %1238 = vst.msk [vmem:[%s1871_s8 + $0x7c] sm:$0xf] %vm1206_vm3, %v1507_v25 }
 0x152 PF: > { %s14_s17 = sadd.s32 1, %s1643_s17   ;;  %s2033_s15 = smov %s1639_s16 }
 0x153   : > { %p11_p5 = scmp.ge.s32.totalorder %s14_s17, 4   ;;  %s2034_s16 = smov %s2036_s18 }
 0x155   :  { %13 = sbr.rel (!%p11_p5) target bundleno = 2 (0x2), region = 83 }

</bundles_post_ra>
